<compile_context>
chip_gen: v6e
topology: v6e:2x2x1
jax: 0.10.0
libtpu: 0.0.40
codegen_flags: <defaults>
</compile_context>

<pallas_src>
import numpy as np
import jax
import jax.numpy as jnp
from jax import lax
from jax.experimental import pallas as pl
from jax.experimental.pallas import tpu as pltpu

HALO = 128        # one (8,128)-aligned sliver of flattened pixels per halo side
SUBLANE = 8       # f32 sublane granule; hidden channels are padded to this


def _silu(y):
    # y * sigmoid(y).  exp() and the approximate reciprocal both issue on the
    # EUP slot, which is otherwise idle in this kernel.
    return y * pl.reciprocal(1.0 + jnp.exp(-y), approx=True)


def _make_c3_kernel(W, PT):
    """Fused C3 kernel for one (batch, row-tile) grid cell.

    Layout is channels-first with flattened pixels on the lane axis, so every
    conv is a (Cout, K) @ (K, pixels) MXU matmul (bf16 operands, f32 acc).
    """
    L = PT + 2 * HALO            # tile + one full 128-lane sliver per side

    def kernel(x_mid_ref, x_top_ref, x_bot_ref,
               w_cv1_ref, b_cv1_ref, w_cv2_ref, b_cv2_ref,
               w_m1_ref, b_m1_ref, w_m2_ref, b_m2_ref,
               w_cv3a_ref, w_cv3b_ref, b_cv3_ref, out_ref):
        i = pl.program_id(1)
        last = pl.num_programs(1) - 1
        Cm_p = w_m2_ref.shape[1]

        # ---- lane-aligned halo assembly (every piece is a 128-lane multiple)
        x_ext = jnp.concatenate(
            [x_top_ref[0], x_mid_ref[0], x_bot_ref[0]], axis=1)      # (C1, L)
        x_bf = x_ext.astype(jnp.bfloat16)

        def conv1x1(w_ref, b_ref, v_bf):
            y = jnp.dot(w_ref[...], v_bf, preferred_element_type=jnp.float32)
            return _silu(y + b_ref[...])

        # ---- C3.cv1 then Bottleneck.cv1 (both 1x1) over the haloed pixels ---
        a_ext = conv1x1(w_cv1_ref, b_cv1_ref, x_bf)                  # (Cm_p, L)
        h_ext = conv1x1(w_m1_ref, b_m1_ref, a_ext.astype(jnp.bfloat16))

        # The 3x3 conv zero-pads its *input* h at the image top/bottom border.
        # Interior tile boundaries keep true neighbouring-row values (the 1x1
        # chain is pointwise, so the halo recompute matches the adjacent tile).
        lane = lax.broadcasted_iota(jnp.int32, (1, L), 1)
        top_pad = jnp.logical_and(
            i == 0, jnp.logical_and(lane >= HALO - W, lane < HALO))
        bot_pad = jnp.logical_and(
            i == last,
            jnp.logical_and(lane >= HALO + PT, lane < HALO + PT + W))
        h_ext = jnp.where(jnp.logical_or(top_pad, bot_pad), 0.0, h_ext)

        # Left/right image-column masks for the dc = +-1 taps.
        col = lax.broadcasted_iota(jnp.int32, (1, PT), 1) % W
        left_edge = col == 0
        right_edge = col == W - 1

        # ---- Bottleneck.cv2: 3x3 conv as 9 accumulated MXU dots -------------
        # Each tap = one pltpu.roll (XLU) + a lane-aligned slice; no
        # lane-unaligned slices, no (9*Cm, PT) im2col concat.
        acc = jnp.zeros((Cm_p, PT), jnp.float32)
        k = 0
        for dr in (-1, 0, 1):            # kernel row  (kh = dr + 1)
            for dc in (-1, 0, 1):        # kernel col  (kw = dc + 1)
                off = dr * W + dc        # tap[p] = h_ext[HALO + p + off]
                if off == 0:
                    tap = h_ext[:, HALO:HALO + PT]
                else:
                    tap = pltpu.roll(h_ext, (-off) % L, 1)[:, HALO:HALO + PT]
                if dc == -1:             # left image column is zero padding
                    tap = jnp.where(left_edge, 0.0, tap)
                elif dc == 1:            # right image column is zero padding
                    tap = jnp.where(right_edge, 0.0, tap)
                acc = acc + jnp.dot(w_m2_ref[k], tap.astype(jnp.bfloat16),
                                    preferred_element_type=jnp.float32)
                k += 1
        y3 = _silu(acc + b_m2_ref[...])                              # (Cm_p, PT)

        # ---- Bottleneck shortcut, C3.cv2 branch, fused C3.cv3 ---------------
        m_out = a_ext[:, HALO:HALO + PT] + y3                        # (Cm_p, PT)
        b_br = conv1x1(w_cv2_ref, b_cv2_ref, x_bf[:, HALO:HALO + PT])

        # cv3(concat([m, b])) == two accumulated dots -> no sublane concat.
        y = jnp.dot(w_cv3a_ref[...], m_out.astype(jnp.bfloat16),
                    preferred_element_type=jnp.float32)
        y = y + jnp.dot(w_cv3b_ref[...], b_br.astype(jnp.bfloat16),
                        preferred_element_type=jnp.float32)
        out = _silu(y + b_cv3_ref[...])                              # (C2, PT)
        out_ref[0] = out.astype(out_ref.dtype)

    return kernel


# ----------------------------- parameter prep --------------------------------
def _fold_bn(gamma, beta, mean, var, eps=1e-5):
    scale = gamma / jnp.sqrt(var + eps)
    return scale, beta - mean * scale


def _pad_rows(w, rows):
    return jnp.pad(w, ((0, rows - w.shape[0]),) + ((0, 0),) * (w.ndim - 1))


def prepare_c3_params(raw):
    """Fold eval-mode BatchNorm into every conv, pad hidden channels to a
    sublane multiple, split cv3 into its two concat halves, and cast the
    matmul weights to bf16 (MXU-native on v5e/v6e/v7x).  Biases stay f32."""
    Cm = raw["w_cv1"].shape[0]
    Cm_p = -(-Cm // SUBLANE) * SUBLANE
    wdt = jnp.bfloat16
    out = {}

    def fold_1x1(name, cin_pad=None):
        w = raw[f"w_{name}"][:, :, 0, 0]                    # (Cout, Cin)
        s, b = _fold_bn(raw[f"g_{name}"], raw[f"be_{name}"],
                        raw[f"mu_{name}"], raw[f"va_{name}"])
        w = s[:, None] * w
        if cin_pad is not None:
            w = jnp.pad(w, ((0, 0), (0, cin_pad - w.shape[1])))
        return w, b

    for name in ("cv1", "cv2"):                             # C1 -> Cm
        w, b = fold_1x1(name)
        out[f"w_{name}"] = _pad_rows(w, Cm_p).astype(wdt)
        out[f"b_{name}"] = _pad_rows(b[:, None], Cm_p).astype(jnp.float32)

    w, b = fold_1x1("m1", cin_pad=Cm_p)                     # Cm -> Cm (1x1)
    out["w_m1"] = _pad_rows(w, Cm_p).astype(wdt)
    out["b_m1"] = _pad_rows(b[:, None], Cm_p).astype(jnp.float32)

    # Bottleneck.cv2 (3x3): stored as (9, Cm_p, Cm_p), row k = kh*3 + kw, so
    # the kernel indexes one tap weight at a time (no im2col weight layout).
    w = raw["w_m2"]                                         # (Cm, Cm, 3, 3)
    s, b = _fold_bn(raw["g_m2"], raw["be_m2"], raw["mu_m2"], raw["va_m2"])
    w = s[:, None, None, None] * w
    w = jnp.transpose(w, (2, 3, 0, 1)).reshape(9, Cm, Cm)   # [kh*3+kw, co, ci]
    w = jnp.pad(w, ((0, 0), (0, Cm_p - Cm), (0, Cm_p - Cm)))
    out["w_m2"] = w.astype(wdt)
    out["b_m2"] = _pad_rows(b[:, None], Cm_p).astype(jnp.float32)

    # C3.cv3: split the (C2, 2*Cm) weight into its two concat halves.
    w, b = fold_1x1("cv3")
    pad = ((0, 0), (0, Cm_p - Cm))
    out["w_cv3a"] = jnp.pad(w[:, :Cm], pad).astype(wdt)
    out["w_cv3b"] = jnp.pad(w[:, Cm:], pad).astype(wdt)
    out["b_cv3"] = b[:, None].astype(jnp.float32)
    return out


# ----------------------------- tiling / VMEM ----------------------------------
def _vmem_limit_bytes():
    """Per-generation VMEM limit derived from the chip: ~54 MiB on 64 MiB
    parts (v7x), capped at ~100 MiB on 128 MiB parts (v5e/v6e)."""
    try:
        cap = pltpu.get_tpu_info().vmem_capacity_bytes
    except Exception:
        cap = 64 << 20            # conservative (v7x-sized) fallback
    return int(min(cap * 0.85, 100 << 20))


def _tile_vmem_bytes(PT, C1, C2, Cm_p):
    """Per-grid-step working set, including double-buffered I/O blocks."""
    L = PT + 2 * HALO
    b = 2 * (C1 * PT + 2 * C1 * HALO) * 4      # pipelined input block + halos
    b += 2 * C2 * PT * 4                       # pipelined output block
    b += C1 * L * (4 + 2)                      # x_ext (f32) + bf16 copy
    b += Cm_p * L * (2 * 4 + 2 * 2)            # a_ext, h_ext + bf16 casts
    b += 3 * Cm_p * PT * 2                     # live rolled taps (bf16)
    b += (3 * Cm_p + 2 * C2) * PT * 4          # y3 acc, m, b branch, cv3 acc
    return b


def _pick_row_tile(B, H, W, C1, C2, Cm_p, vmem_limit):
    """Largest row tile that divides H, keeps TH*W a 128-multiple, fits in a
    conservative share of VMEM, and leaves >=6 (then >=4) total grid steps so
    the pipeline and both v7x TensorCores stay busy even at batch 1."""
    budget = vmem_limit // 2
    cands = [th for th in range(H, 0, -1)
             if H % th == 0 and (th * W) % 128 == 0]
    fitting = [th for th in cands
               if _tile_vmem_bytes(th * W, C1, C2, Cm_p) <= budget]
    if not fitting:
        return cands[-1] if cands else H
    for min_steps in (6, 4, 2, 1):
        for th in fitting:                     # descending -> largest first
            if B * (H // th) >= min_steps:
                return th
    return fitting[-1]


# ----------------------------- forward wrapper --------------------------------
def c3_forward(x_nchw, params, row_tile=None):
    """C3 forward (eval-mode BN folded) on NCHW input via one fused pallas_call."""
    B, C1, H, W = x_nchw.shape
    Cm_p = params["w_cv1"].shape[0]
    C2 = params["w_cv3a"].shape[0]

    # Halo slivers assume a 128-aligned flattened image with one image row per
    # 128-lane sliver; the roll construction additionally needs W <= 127.
    assert W <= 127 and (H * W) % 128 == 0, "unsupported spatial shape"

    vmem_limit = _vmem_limit_bytes()
    TH = row_tile if row_tile is not None else _pick_row_tile(
        B, H, W, C1, C2, Cm_p, vmem_limit)
    assert H % TH == 0 and (TH * W) % 128 == 0
    NT = H // TH                            # row tiles per image
    PT = TH * W                             # pixels per tile
    KP = PT // HALO                         # 128-lane blocks per tile
    NBLK = (H * W) // HALO                  # 128-lane blocks per image

    x_flat = x_nchw.reshape(B, C1, H * W)   # free reshape: stays NCHW-native

    def mid_map(b, i): return (b, 0, i)
    def top_map(b, i): return (b, 0, jnp.maximum(i * KP - 1, 0))
    def bot_map(b, i): return (b, 0, jnp.minimum((i + 1) * KP, NBLK - 1))

    p = params
    param_args = [p["w_cv1"], p["b_cv1"], p["w_cv2"], p["b_cv2"],
                  p["w_m1"], p["b_m1"], p["w_m2"], p["b_m2"],
                  p["w_cv3a"], p["w_cv3b"], p["b_cv3"]]

    def const_spec(a):
        return pl.BlockSpec(a.shape, lambda b, i, _r=a.ndim: (0,) * _r)

    in_specs = ([pl.BlockSpec((1, C1, PT), mid_map),
                 pl.BlockSpec((1, C1, HALO), top_map),
                 pl.BlockSpec((1, C1, HALO), bot_map)]
                + [const_spec(a) for a in param_args])

    out_flat = pl.pallas_call(
        _make_c3_kernel(W, PT),
        out_shape=jax.ShapeDtypeStruct((B, C2, H * W), x_nchw.dtype),
        grid=(B, NT),
        in_specs=in_specs,
        out_specs=pl.BlockSpec((1, C2, PT), mid_map),
        compiler_params=pltpu.CompilerParams(
            dimension_semantics=("parallel", "parallel"),
            vmem_limit_bytes=vmem_limit),
    )(x_flat, x_flat, x_flat, *param_args)

    return out_flat.reshape(B, C2, H, W)


# ---------------- reference (plain JAX) for a correctness check ----------------
def _ref_conv_bn_silu(x, w, g, be, mu, va, pad, eps=1e-5):
    y = lax.conv_general_dilated(
        x, w, (1, 1), [(pad, pad), (pad, pad)],
        dimension_numbers=("NCHW", "OIHW", "NCHW"))
    y = (y - mu.reshape(1, -1, 1, 1)) * (
        g.reshape(1, -1, 1, 1) / jnp.sqrt(va.reshape(1, -1, 1, 1) + eps))
    y = y + be.reshape(1, -1, 1, 1)
    return y * jax.nn.sigmoid(y)


def _ref_c3(x, raw):
    def cbs(name, v, pad=0):
        return _ref_conv_bn_silu(v, raw[f"w_{name}"], raw[f"g_{name}"],
                                 raw[f"be_{name}"], raw[f"mu_{name}"],
                                 raw[f"va_{name}"], pad)
    a = cbs("cv1", x)
    b = cbs("cv2", x)
    h = cbs("m1", a)
    y3 = cbs("m2", h, pad=1)
    cat = jnp.concatenate([a + y3, b], axis=1)      # [m(cv1(x)), cv2(x)]
    return cbs("cv3", cat)


if __name__ == "__main__":
    # C3(c1=4, c2=4, n=1, shortcut=True, e=0.5) on x of shape (2, 4, 16, 16).
    B, C1, C2, H, W = 2, 4, 4, 16, 16
    Cm = int(C2 * 0.5)          # hidden channels c_ = 2

    def conv_bn(key, cin, cout, k):
        kw, kg, kb, km, kv = jax.random.split(key, 5)
        return dict(
            w=jax.random.normal(kw, (cout, cin, k, k), jnp.float32)
              / np.sqrt(cin * k * k),
            g=1.0 + 0.1 * jax.random.normal(kg, (cout,), jnp.float32),
            be=0.1 * jax.random.normal(kb, (cout,), jnp.float32),
            mu=0.05 * jax.random.normal(km, (cout,), jnp.float32),
            va=1.0 + 0.1 * jax.random.uniform(kv, (cout,), jnp.float32))

    keys = jax.random.split(jax.random.PRNGKey(0), 6)
    layers = {
        "cv1": conv_bn(keys[0], C1, Cm, 1),       # C3.cv1 (1x1)
        "cv2": conv_bn(keys[1], C1, Cm, 1),       # C3.cv2 (1x1)
        "m1":  conv_bn(keys[2], Cm, Cm, 1),       # Bottleneck.cv1 (1x1, e=1.0)
        "m2":  conv_bn(keys[3], Cm, Cm, 3),       # Bottleneck.cv2 (3x3)
        "cv3": conv_bn(keys[4], 2 * Cm, C2, 1),   # C3.cv3 (1x1)
    }
    raw = {f"{f}_{lname}": v
           for lname, d in layers.items() for f, v in d.items()}

    x = jax.random.normal(keys[5], (B, C1, H, W), jnp.float32)  # NCHW input

    params = prepare_c3_params(raw)
    out = jax.block_until_ready(jax.jit(c3_forward)(x, params))
    assert out.shape == (B, C2, H, W)

    ref = jax.block_until_ready(_ref_c3(x, raw))
    # bf16 MXU operands + approx reciprocal in SiLU -> relaxed tolerance.
    np.testing.assert_allclose(np.asarray(out), np.asarray(ref),
                               rtol=5e-2, atol=5e-2)
    print("KERNEL_OK")
</pallas_src>

<mosaic_0001>
module attributes {stable_mosaic.version = 11 : i64} {
  func.func @kernel(%arg0: i32, %arg1: i32, %arg2: memref<1x4x128xf32, #tpu.memory_space<vmem>>, %arg3: memref<1x4x128xf32, #tpu.memory_space<vmem>>, %arg4: memref<1x4x128xf32, #tpu.memory_space<vmem>>, %arg5: memref<8x4xbf16, #tpu.memory_space<vmem>>, %arg6: memref<8x1xf32, #tpu.memory_space<vmem>>, %arg7: memref<8x4xbf16, #tpu.memory_space<vmem>>, %arg8: memref<8x1xf32, #tpu.memory_space<vmem>>, %arg9: memref<8x8xbf16, #tpu.memory_space<vmem>>, %arg10: memref<8x1xf32, #tpu.memory_space<vmem>>, %arg11: memref<9x8x8xbf16, #tpu.memory_space<vmem>>, %arg12: memref<8x1xf32, #tpu.memory_space<vmem>>, %arg13: memref<4x8xbf16, #tpu.memory_space<vmem>>, %arg14: memref<4x8xbf16, #tpu.memory_space<vmem>>, %arg15: memref<4x1xf32, #tpu.memory_space<vmem>>, %arg16: memref<1x4x128xf32, #tpu.memory_space<vmem>>) attributes {dimension_semantics = [#tpu.dimension_semantics<parallel>, #tpu.dimension_semantics<parallel>], iteration_bounds = array<i64: 2, 2>, scalar_prefetch = 0 : i64, scratch_operands = 0 : i64, tpu.core_type = #tpu.core_type<tc>, window_params = [{transform_indices = @transform_0, window_bounds = array<i64: 1, 4, 128>}, {transform_indices = @transform_1, window_bounds = array<i64: 1, 4, 128>}, {transform_indices = @transform_2, window_bounds = array<i64: 1, 4, 128>}, {pipeline_mode = #tpu.pipeline_mode<synchronous>, transform_indices = @transform_3, window_bounds = array<i64: 8, 4>}, {pipeline_mode = #tpu.pipeline_mode<synchronous>, transform_indices = @transform_4, window_bounds = array<i64: 8, 1>}, {pipeline_mode = #tpu.pipeline_mode<synchronous>, transform_indices = @transform_5, window_bounds = array<i64: 8, 4>}, {pipeline_mode = #tpu.pipeline_mode<synchronous>, transform_indices = @transform_6, window_bounds = array<i64: 8, 1>}, {pipeline_mode = #tpu.pipeline_mode<synchronous>, transform_indices = @transform_7, window_bounds = array<i64: 8, 8>}, {pipeline_mode = #tpu.pipeline_mode<synchronous>, transform_indices = @transform_8, window_bounds = array<i64: 8, 1>}, {pipeline_mode = #tpu.pipeline_mode<synchronous>, transform_indices = @transform_9, window_bounds = array<i64: 9, 8, 8>}, {pipeline_mode = #tpu.pipeline_mode<synchronous>, transform_indices = @transform_10, window_bounds = array<i64: 8, 1>}, {pipeline_mode = #tpu.pipeline_mode<synchronous>, transform_indices = @transform_11, window_bounds = array<i64: 4, 8>}, {pipeline_mode = #tpu.pipeline_mode<synchronous>, transform_indices = @transform_12, window_bounds = array<i64: 4, 8>}, {pipeline_mode = #tpu.pipeline_mode<synchronous>, transform_indices = @transform_13, window_bounds = array<i64: 4, 1>}, {transform_indices = @transform_14, window_bounds = array<i64: 1, 4, 128>}]} {
    %c0 = arith.constant 0 : index
    %c0_0 = arith.constant 0 : index
    %c0_1 = arith.constant 0 : index
    %0 = vector.load %arg3[%c0, %c0_0, %c0_1] : memref<1x4x128xf32, #tpu.memory_space<vmem>>, vector<1x4x128xf32>
    %1 = vector.shape_cast %0 : vector<1x4x128xf32> to vector<4x128xf32>
    %c0_2 = arith.constant 0 : index
    %c0_3 = arith.constant 0 : index
    %c0_4 = arith.constant 0 : index
    %2 = vector.load %arg2[%c0_2, %c0_3, %c0_4] : memref<1x4x128xf32, #tpu.memory_space<vmem>>, vector<1x4x128xf32>
    %3 = vector.shape_cast %2 : vector<1x4x128xf32> to vector<4x128xf32>
    %c0_5 = arith.constant 0 : index
    %c0_6 = arith.constant 0 : index
    %c0_7 = arith.constant 0 : index
    %4 = vector.load %arg4[%c0_5, %c0_6, %c0_7] : memref<1x4x128xf32, #tpu.memory_space<vmem>>, vector<1x4x128xf32>
    %5 = vector.shape_cast %4 : vector<1x4x128xf32> to vector<4x128xf32>
    %6 = tpu.concatenate %1, %3, %5 in 1 : vector<4x128xf32>, vector<4x128xf32>, vector<4x128xf32> -> vector<4x384xf32>
    %7 = arith.truncf %6 : vector<4x384xf32> to vector<4x384xbf16>
    %c0_8 = arith.constant 0 : index
    %c0_9 = arith.constant 0 : index
    %8 = vector.load %arg5[%c0_8, %c0_9] : memref<8x4xbf16, #tpu.memory_space<vmem>>, vector<8x4xbf16>
    %cst = arith.constant dense<0.000000e+00> : vector<8x384xf32>
    %9 = tpu.matmul %8, %7, %cst {dimension_numbers = #tpu.dot_dimension_numbers<[1], [0], [0], [1], [0, 0, 1, 1], [], []>} : vector<8x4xbf16>, vector<4x384xbf16>, vector<8x384xf32> -> vector<8x384xf32>
    %c0_10 = arith.constant 0 : index
    %c0_11 = arith.constant 0 : index
    %10 = vector.load %arg6[%c0_10, %c0_11] : memref<8x1xf32, #tpu.memory_space<vmem>>, vector<8x1xf32>
    %11 = vector.broadcast %10 : vector<8x1xf32> to vector<8x384xf32>
    %12 = arith.addf %9, %11 : vector<8x384xf32>
    %cst_12 = arith.constant 0.000000e+00 : f32
    %13 = vector.broadcast %cst_12 : f32 to vector<8x384xf32>
    %14 = arith.subf %13, %12 : vector<8x384xf32>
    %15 = math.exp %14 : vector<8x384xf32>
    %cst_13 = arith.constant 1.000000e+00 : f32
    %16 = vector.broadcast %cst_13 : f32 to vector<8x384xf32>
    %17 = arith.addf %16, %15 : vector<8x384xf32>
    %18 = tpu.reciprocal %17 {approx = true} : vector<8x384xf32> -> vector<8x384xf32>
    %19 = arith.mulf %12, %18 : vector<8x384xf32>
    %20 = arith.truncf %19 : vector<8x384xf32> to vector<8x384xbf16>
    %c0_14 = arith.constant 0 : index
    %c0_15 = arith.constant 0 : index
    %21 = vector.load %arg9[%c0_14, %c0_15] : memref<8x8xbf16, #tpu.memory_space<vmem>>, vector<8x8xbf16>
    %cst_16 = arith.constant dense<0.000000e+00> : vector<8x384xf32>
    %22 = tpu.matmul %21, %20, %cst_16 {dimension_numbers = #tpu.dot_dimension_numbers<[1], [0], [0], [1], [0, 0, 1, 1], [], []>} : vector<8x8xbf16>, vector<8x384xbf16>, vector<8x384xf32> -> vector<8x384xf32>
    %c0_17 = arith.constant 0 : index
    %c0_18 = arith.constant 0 : index
    %23 = vector.load %arg10[%c0_17, %c0_18] : memref<8x1xf32, #tpu.memory_space<vmem>>, vector<8x1xf32>
    %24 = vector.broadcast %23 : vector<8x1xf32> to vector<8x384xf32>
    %25 = arith.addf %22, %24 : vector<8x384xf32>
    %cst_19 = arith.constant 0.000000e+00 : f32
    %26 = vector.broadcast %cst_19 : f32 to vector<8x384xf32>
    %27 = arith.subf %26, %25 : vector<8x384xf32>
    %28 = math.exp %27 : vector<8x384xf32>
    %cst_20 = arith.constant 1.000000e+00 : f32
    %29 = vector.broadcast %cst_20 : f32 to vector<8x384xf32>
    %30 = arith.addf %29, %28 : vector<8x384xf32>
    %31 = tpu.reciprocal %30 {approx = true} : vector<8x384xf32> -> vector<8x384xf32>
    %32 = arith.mulf %25, %31 : vector<8x384xf32>
    %33 = tpu.iota {dimensions = array<i32: 1>} : vector<1x384xi32>
    %c0_i32 = arith.constant 0 : i32
    %34 = arith.cmpi eq, %arg1, %c0_i32 : i32
    %c112_i32 = arith.constant 112 : i32
    %35 = vector.broadcast %c112_i32 : i32 to vector<1x384xi32>
    %36 = arith.cmpi sge, %33, %35 : vector<1x384xi32>
    %c128_i32 = arith.constant 128 : i32
    %37 = vector.broadcast %c128_i32 : i32 to vector<1x384xi32>
    %38 = arith.cmpi slt, %33, %37 : vector<1x384xi32>
    %39 = arith.andi %36, %38 : vector<1x384xi1>
    %40 = vector.broadcast %34 : i1 to vector<1x384xi1>
    %41 = arith.andi %40, %39 : vector<1x384xi1>
    %c1_i32 = arith.constant 1 : i32
    %42 = arith.cmpi eq, %arg1, %c1_i32 : i32
    %c256_i32 = arith.constant 256 : i32
    %43 = vector.broadcast %c256_i32 : i32 to vector<1x384xi32>
    %44 = arith.cmpi sge, %33, %43 : vector<1x384xi32>
    %c272_i32 = arith.constant 272 : i32
    %45 = vector.broadcast %c272_i32 : i32 to vector<1x384xi32>
    %46 = arith.cmpi slt, %33, %45 : vector<1x384xi32>
    %47 = arith.andi %44, %46 : vector<1x384xi1>
    %48 = vector.broadcast %42 : i1 to vector<1x384xi1>
    %49 = arith.andi %48, %47 : vector<1x384xi1>
    %50 = arith.ori %41, %49 : vector<1x384xi1>
    %cst_21 = arith.constant 0.000000e+00 : f32
    %51 = vector.shape_cast %50 : vector<1x384xi1> to vector<1x384xi1>
    %52 = vector.broadcast %51 : vector<1x384xi1> to vector<8x384xi1>
    %53 = vector.broadcast %cst_21 : f32 to vector<8x384xf32>
    %54 = arith.select %52, %53, %32 : vector<8x384xi1>, vector<8x384xf32>
    %55 = tpu.iota {dimensions = array<i32: 1>} : vector<1x128xi32>
    %c16_i32 = arith.constant 16 : i32
    %c0_i32_22 = arith.constant 0 : i32
    %56 = arith.cmpi eq, %c16_i32, %c0_i32_22 : i32
    %c1_i32_23 = arith.constant 1 : i32
    %57 = arith.select %56, %c1_i32_23, %c16_i32 : i32
    %58 = vector.broadcast %57 : i32 to vector<1x128xi32>
    %59 = arith.remsi %55, %58 : vector<1x128xi32>
    %c0_i32_24 = arith.constant 0 : i32
    %60 = vector.broadcast %c0_i32_24 : i32 to vector<1x128xi32>
    %61 = arith.cmpi ne, %59, %60 : vector<1x128xi32>
    %c0_i32_25 = arith.constant 0 : i32
    %62 = vector.broadcast %c0_i32_25 : i32 to vector<1x128xi32>
    %63 = arith.cmpi slt, %59, %62 : vector<1x128xi32>
    %c0_i32_26 = arith.constant 0 : i32
    %64 = arith.cmpi slt, %57, %c0_i32_26 : i32
    %65 = vector.broadcast %64 : i1 to vector<1x128xi1>
    %66 = vector.broadcast %65 : vector<1x128xi1> to vector<1x128xi1>
    %67 = arith.xori %63, %66 : vector<1x128xi1>
    %68 = arith.andi %67, %61 : vector<1x128xi1>
    %69 = vector.broadcast %57 : i32 to vector<1x128xi32>
    %70 = arith.addi %59, %69 : vector<1x128xi32>
    %71 = arith.select %68, %70, %59 : vector<1x128xi1>, vector<1x128xi32>
    %c0_i32_27 = arith.constant 0 : i32
    %72 = vector.broadcast %c0_i32_27 : i32 to vector<1x128xi32>
    %73 = arith.cmpi eq, %71, %72 : vector<1x128xi32>
    %c15_i32 = arith.constant 15 : i32
    %74 = vector.broadcast %c15_i32 : i32 to vector<1x128xi32>
    %75 = arith.cmpi eq, %71, %74 : vector<1x128xi32>
    %cst_28 = arith.constant 0.000000e+00 : f32
    %76 = vector.broadcast %cst_28 : f32 to vector<8x128xf32>
    %c17_i32 = arith.constant 17 : i32
    %77 = tpu.dynamic_rotate %54 by %c17_i32 dim 1 : vector<8x384xf32>, i32 -> vector<8x384xf32>
    %78 = vector.extract_strided_slice %77 {offsets = [0, 128], sizes = [8, 128], strides = [1, 1]} : vector<8x384xf32> to vector<8x128xf32>
    %cst_29 = arith.constant 0.000000e+00 : f32
    %79 = vector.shape_cast %73 : vector<1x128xi1> to vector<1x128xi1>
    %80 = vector.broadcast %79 : vector<1x128xi1> to vector<8x128xi1>
    %81 = vector.broadcast %cst_29 : f32 to vector<8x128xf32>
    %82 = arith.select %80, %81, %78 : vector<8x128xi1>, vector<8x128xf32>
    %c0_30 = arith.constant 0 : index
    %c0_31 = arith.constant 0 : index
    %c0_32 = arith.constant 0 : index
    %83 = vector.load %arg11[%c0_30, %c0_31, %c0_32] : memref<9x8x8xbf16, #tpu.memory_space<vmem>>, vector<1x8x8xbf16>
    %84 = vector.shape_cast %83 : vector<1x8x8xbf16> to vector<8x8xbf16>
    %85 = arith.truncf %82 : vector<8x128xf32> to vector<8x128xbf16>
    %cst_33 = arith.constant dense<0.000000e+00> : vector<8x128xf32>
    %86 = tpu.matmul %84, %85, %cst_33 {dimension_numbers = #tpu.dot_dimension_numbers<[1], [0], [0], [1], [0, 0, 1, 1], [], []>} : vector<8x8xbf16>, vector<8x128xbf16>, vector<8x128xf32> -> vector<8x128xf32>
    %87 = arith.addf %76, %86 : vector<8x128xf32>
    %c16_i32_34 = arith.constant 16 : i32
    %88 = tpu.dynamic_rotate %54 by %c16_i32_34 dim 1 : vector<8x384xf32>, i32 -> vector<8x384xf32>
    %89 = vector.extract_strided_slice %88 {offsets = [0, 128], sizes = [8, 128], strides = [1, 1]} : vector<8x384xf32> to vector<8x128xf32>
    %c1 = arith.constant 1 : index
    %c0_35 = arith.constant 0 : index
    %c0_36 = arith.constant 0 : index
    %90 = vector.load %arg11[%c1, %c0_35, %c0_36] : memref<9x8x8xbf16, #tpu.memory_space<vmem>>, vector<1x8x8xbf16>
    %91 = vector.shape_cast %90 : vector<1x8x8xbf16> to vector<8x8xbf16>
    %92 = arith.truncf %89 : vector<8x128xf32> to vector<8x128xbf16>
    %cst_37 = arith.constant dense<0.000000e+00> : vector<8x128xf32>
    %93 = tpu.matmul %91, %92, %cst_37 {dimension_numbers = #tpu.dot_dimension_numbers<[1], [0], [0], [1], [0, 0, 1, 1], [], []>} : vector<8x8xbf16>, vector<8x128xbf16>, vector<8x128xf32> -> vector<8x128xf32>
    %94 = arith.addf %87, %93 : vector<8x128xf32>
    %c15_i32_38 = arith.constant 15 : i32
    %95 = tpu.dynamic_rotate %54 by %c15_i32_38 dim 1 : vector<8x384xf32>, i32 -> vector<8x384xf32>
    %96 = vector.extract_strided_slice %95 {offsets = [0, 128], sizes = [8, 128], strides = [1, 1]} : vector<8x384xf32> to vector<8x128xf32>
    %cst_39 = arith.constant 0.000000e+00 : f32
    %97 = vector.shape_cast %75 : vector<1x128xi1> to vector<1x128xi1>
    %98 = vector.broadcast %97 : vector<1x128xi1> to vector<8x128xi1>
    %99 = vector.broadcast %cst_39 : f32 to vector<8x128xf32>
    %100 = arith.select %98, %99, %96 : vector<8x128xi1>, vector<8x128xf32>
    %c2 = arith.constant 2 : index
    %c0_40 = arith.constant 0 : index
    %c0_41 = arith.constant 0 : index
    %101 = vector.load %arg11[%c2, %c0_40, %c0_41] : memref<9x8x8xbf16, #tpu.memory_space<vmem>>, vector<1x8x8xbf16>
    %102 = vector.shape_cast %101 : vector<1x8x8xbf16> to vector<8x8xbf16>
    %103 = arith.truncf %100 : vector<8x128xf32> to vector<8x128xbf16>
    %cst_42 = arith.constant dense<0.000000e+00> : vector<8x128xf32>
    %104 = tpu.matmul %102, %103, %cst_42 {dimension_numbers = #tpu.dot_dimension_numbers<[1], [0], [0], [1], [0, 0, 1, 1], [], []>} : vector<8x8xbf16>, vector<8x128xbf16>, vector<8x128xf32> -> vector<8x128xf32>
    %105 = arith.addf %94, %104 : vector<8x128xf32>
    %c1_i32_43 = arith.constant 1 : i32
    %106 = tpu.dynamic_rotate %54 by %c1_i32_43 dim 1 : vector<8x384xf32>, i32 -> vector<8x384xf32>
    %107 = vector.extract_strided_slice %106 {offsets = [0, 128], sizes = [8, 128], strides = [1, 1]} : vector<8x384xf32> to vector<8x128xf32>
    %cst_44 = arith.constant 0.000000e+00 : f32
    %108 = vector.shape_cast %73 : vector<1x128xi1> to vector<1x128xi1>
    %109 = vector.broadcast %108 : vector<1x128xi1> to vector<8x128xi1>
    %110 = vector.broadcast %cst_44 : f32 to vector<8x128xf32>
    %111 = arith.select %109, %110, %107 : vector<8x128xi1>, vector<8x128xf32>
    %c3 = arith.constant 3 : index
    %c0_45 = arith.constant 0 : index
    %c0_46 = arith.constant 0 : index
    %112 = vector.load %arg11[%c3, %c0_45, %c0_46] : memref<9x8x8xbf16, #tpu.memory_space<vmem>>, vector<1x8x8xbf16>
    %113 = vector.shape_cast %112 : vector<1x8x8xbf16> to vector<8x8xbf16>
    %114 = arith.truncf %111 : vector<8x128xf32> to vector<8x128xbf16>
    %cst_47 = arith.constant dense<0.000000e+00> : vector<8x128xf32>
    %115 = tpu.matmul %113, %114, %cst_47 {dimension_numbers = #tpu.dot_dimension_numbers<[1], [0], [0], [1], [0, 0, 1, 1], [], []>} : vector<8x8xbf16>, vector<8x128xbf16>, vector<8x128xf32> -> vector<8x128xf32>
    %116 = arith.addf %105, %115 : vector<8x128xf32>
    %117 = vector.extract_strided_slice %54 {offsets = [0, 128], sizes = [8, 128], strides = [1, 1]} : vector<8x384xf32> to vector<8x128xf32>
    %c4 = arith.constant 4 : index
    %c0_48 = arith.constant 0 : index
    %c0_49 = arith.constant 0 : index
    %118 = vector.load %arg11[%c4, %c0_48, %c0_49] : memref<9x8x8xbf16, #tpu.memory_space<vmem>>, vector<1x8x8xbf16>
    %119 = vector.shape_cast %118 : vector<1x8x8xbf16> to vector<8x8xbf16>
    %120 = arith.truncf %117 : vector<8x128xf32> to vector<8x128xbf16>
    %cst_50 = arith.constant dense<0.000000e+00> : vector<8x128xf32>
    %121 = tpu.matmul %119, %120, %cst_50 {dimension_numbers = #tpu.dot_dimension_numbers<[1], [0], [0], [1], [0, 0, 1, 1], [], []>} : vector<8x8xbf16>, vector<8x128xbf16>, vector<8x128xf32> -> vector<8x128xf32>
    %122 = arith.addf %116, %121 : vector<8x128xf32>
    %c383_i32 = arith.constant 383 : i32
    %123 = tpu.dynamic_rotate %54 by %c383_i32 dim 1 : vector<8x384xf32>, i32 -> vector<8x384xf32>
    %124 = vector.extract_strided_slice %123 {offsets = [0, 128], sizes = [8, 128], strides = [1, 1]} : vector<8x384xf32> to vector<8x128xf32>
    %cst_51 = arith.constant 0.000000e+00 : f32
    %125 = vector.shape_cast %75 : vector<1x128xi1> to vector<1x128xi1>
    %126 = vector.broadcast %125 : vector<1x128xi1> to vector<8x128xi1>
    %127 = vector.broadcast %cst_51 : f32 to vector<8x128xf32>
    %128 = arith.select %126, %127, %124 : vector<8x128xi1>, vector<8x128xf32>
    %c5 = arith.constant 5 : index
    %c0_52 = arith.constant 0 : index
    %c0_53 = arith.constant 0 : index
    %129 = vector.load %arg11[%c5, %c0_52, %c0_53] : memref<9x8x8xbf16, #tpu.memory_space<vmem>>, vector<1x8x8xbf16>
    %130 = vector.shape_cast %129 : vector<1x8x8xbf16> to vector<8x8xbf16>
    %131 = arith.truncf %128 : vector<8x128xf32> to vector<8x128xbf16>
    %cst_54 = arith.constant dense<0.000000e+00> : vector<8x128xf32>
    %132 = tpu.matmul %130, %131, %cst_54 {dimension_numbers = #tpu.dot_dimension_numbers<[1], [0], [0], [1], [0, 0, 1, 1], [], []>} : vector<8x8xbf16>, vector<8x128xbf16>, vector<8x128xf32> -> vector<8x128xf32>
    %133 = arith.addf %122, %132 : vector<8x128xf32>
    %c369_i32 = arith.constant 369 : i32
    %134 = tpu.dynamic_rotate %54 by %c369_i32 dim 1 : vector<8x384xf32>, i32 -> vector<8x384xf32>
    %135 = vector.extract_strided_slice %134 {offsets = [0, 128], sizes = [8, 128], strides = [1, 1]} : vector<8x384xf32> to vector<8x128xf32>
    %cst_55 = arith.constant 0.000000e+00 : f32
    %136 = vector.shape_cast %73 : vector<1x128xi1> to vector<1x128xi1>
    %137 = vector.broadcast %136 : vector<1x128xi1> to vector<8x128xi1>
    %138 = vector.broadcast %cst_55 : f32 to vector<8x128xf32>
    %139 = arith.select %137, %138, %135 : vector<8x128xi1>, vector<8x128xf32>
    %c6 = arith.constant 6 : index
    %c0_56 = arith.constant 0 : index
    %c0_57 = arith.constant 0 : index
    %140 = vector.load %arg11[%c6, %c0_56, %c0_57] : memref<9x8x8xbf16, #tpu.memory_space<vmem>>, vector<1x8x8xbf16>
    %141 = vector.shape_cast %140 : vector<1x8x8xbf16> to vector<8x8xbf16>
    %142 = arith.truncf %139 : vector<8x128xf32> to vector<8x128xbf16>
    %cst_58 = arith.constant dense<0.000000e+00> : vector<8x128xf32>
    %143 = tpu.matmul %141, %142, %cst_58 {dimension_numbers = #tpu.dot_dimension_numbers<[1], [0], [0], [1], [0, 0, 1, 1], [], []>} : vector<8x8xbf16>, vector<8x128xbf16>, vector<8x128xf32> -> vector<8x128xf32>
    %144 = arith.addf %133, %143 : vector<8x128xf32>
    %c368_i32 = arith.constant 368 : i32
    %145 = tpu.dynamic_rotate %54 by %c368_i32 dim 1 : vector<8x384xf32>, i32 -> vector<8x384xf32>
    %146 = vector.extract_strided_slice %145 {offsets = [0, 128], sizes = [8, 128], strides = [1, 1]} : vector<8x384xf32> to vector<8x128xf32>
    %c7 = arith.constant 7 : index
    %c0_59 = arith.constant 0 : index
    %c0_60 = arith.constant 0 : index
    %147 = vector.load %arg11[%c7, %c0_59, %c0_60] : memref<9x8x8xbf16, #tpu.memory_space<vmem>>, vector<1x8x8xbf16>
    %148 = vector.shape_cast %147 : vector<1x8x8xbf16> to vector<8x8xbf16>
    %149 = arith.truncf %146 : vector<8x128xf32> to vector<8x128xbf16>
    %cst_61 = arith.constant dense<0.000000e+00> : vector<8x128xf32>
    %150 = tpu.matmul %148, %149, %cst_61 {dimension_numbers = #tpu.dot_dimension_numbers<[1], [0], [0], [1], [0, 0, 1, 1], [], []>} : vector<8x8xbf16>, vector<8x128xbf16>, vector<8x128xf32> -> vector<8x128xf32>
    %151 = arith.addf %144, %150 : vector<8x128xf32>
    %c367_i32 = arith.constant 367 : i32
    %152 = tpu.dynamic_rotate %54 by %c367_i32 dim 1 : vector<8x384xf32>, i32 -> vector<8x384xf32>
    %153 = vector.extract_strided_slice %152 {offsets = [0, 128], sizes = [8, 128], strides = [1, 1]} : vector<8x384xf32> to vector<8x128xf32>
    %cst_62 = arith.constant 0.000000e+00 : f32
    %154 = vector.shape_cast %75 : vector<1x128xi1> to vector<1x128xi1>
    %155 = vector.broadcast %154 : vector<1x128xi1> to vector<8x128xi1>
    %156 = vector.broadcast %cst_62 : f32 to vector<8x128xf32>
    %157 = arith.select %155, %156, %153 : vector<8x128xi1>, vector<8x128xf32>
    %c8 = arith.constant 8 : index
    %c0_63 = arith.constant 0 : index
    %c0_64 = arith.constant 0 : index
    %158 = vector.load %arg11[%c8, %c0_63, %c0_64] : memref<9x8x8xbf16, #tpu.memory_space<vmem>>, vector<1x8x8xbf16>
    %159 = vector.shape_cast %158 : vector<1x8x8xbf16> to vector<8x8xbf16>
    %160 = arith.truncf %157 : vector<8x128xf32> to vector<8x128xbf16>
    %cst_65 = arith.constant dense<0.000000e+00> : vector<8x128xf32>
    %161 = tpu.matmul %159, %160, %cst_65 {dimension_numbers = #tpu.dot_dimension_numbers<[1], [0], [0], [1], [0, 0, 1, 1], [], []>} : vector<8x8xbf16>, vector<8x128xbf16>, vector<8x128xf32> -> vector<8x128xf32>
    %162 = arith.addf %151, %161 : vector<8x128xf32>
    %c0_66 = arith.constant 0 : index
    %c0_67 = arith.constant 0 : index
    %163 = vector.load %arg12[%c0_66, %c0_67] : memref<8x1xf32, #tpu.memory_space<vmem>>, vector<8x1xf32>
    %164 = vector.broadcast %163 : vector<8x1xf32> to vector<8x128xf32>
    %165 = arith.addf %162, %164 : vector<8x128xf32>
    %cst_68 = arith.constant 0.000000e+00 : f32
    %166 = vector.broadcast %cst_68 : f32 to vector<8x128xf32>
    %167 = arith.subf %166, %165 : vector<8x128xf32>
    %168 = math.exp %167 : vector<8x128xf32>
    %cst_69 = arith.constant 1.000000e+00 : f32
    %169 = vector.broadcast %cst_69 : f32 to vector<8x128xf32>
    %170 = arith.addf %169, %168 : vector<8x128xf32>
    %171 = tpu.reciprocal %170 {approx = true} : vector<8x128xf32> -> vector<8x128xf32>
    %172 = arith.mulf %165, %171 : vector<8x128xf32>
    %173 = vector.extract_strided_slice %19 {offsets = [0, 128], sizes = [8, 128], strides = [1, 1]} : vector<8x384xf32> to vector<8x128xf32>
    %174 = arith.addf %173, %172 : vector<8x128xf32>
    %175 = vector.extract_strided_slice %7 {offsets = [0, 128], sizes = [4, 128], strides = [1, 1]} : vector<4x384xbf16> to vector<4x128xbf16>
    %c0_70 = arith.constant 0 : index
    %c0_71 = arith.constant 0 : index
    %176 = vector.load %arg7[%c0_70, %c0_71] : memref<8x4xbf16, #tpu.memory_space<vmem>>, vector<8x4xbf16>
    %cst_72 = arith.constant dense<0.000000e+00> : vector<8x128xf32>
    %177 = tpu.matmul %176, %175, %cst_72 {dimension_numbers = #tpu.dot_dimension_numbers<[1], [0], [0], [1], [0, 0, 1, 1], [], []>} : vector<8x4xbf16>, vector<4x128xbf16>, vector<8x128xf32> -> vector<8x128xf32>
    %c0_73 = arith.constant 0 : index
    %c0_74 = arith.constant 0 : index
    %178 = vector.load %arg8[%c0_73, %c0_74] : memref<8x1xf32, #tpu.memory_space<vmem>>, vector<8x1xf32>
    %179 = vector.broadcast %178 : vector<8x1xf32> to vector<8x128xf32>
    %180 = arith.addf %177, %179 : vector<8x128xf32>
    %cst_75 = arith.constant 0.000000e+00 : f32
    %181 = vector.broadcast %cst_75 : f32 to vector<8x128xf32>
    %182 = arith.subf %181, %180 : vector<8x128xf32>
    %183 = math.exp %182 : vector<8x128xf32>
    %cst_76 = arith.constant 1.000000e+00 : f32
    %184 = vector.broadcast %cst_76 : f32 to vector<8x128xf32>
    %185 = arith.addf %184, %183 : vector<8x128xf32>
    %186 = tpu.reciprocal %185 {approx = true} : vector<8x128xf32> -> vector<8x128xf32>
    %187 = arith.mulf %180, %186 : vector<8x128xf32>
    %c0_77 = arith.constant 0 : index
    %c0_78 = arith.constant 0 : index
    %188 = vector.load %arg13[%c0_77, %c0_78] : memref<4x8xbf16, #tpu.memory_space<vmem>>, vector<4x8xbf16>
    %189 = arith.truncf %174 : vector<8x128xf32> to vector<8x128xbf16>
    %cst_79 = arith.constant dense<0.000000e+00> : vector<4x128xf32>
    %190 = tpu.matmul %188, %189, %cst_79 {dimension_numbers = #tpu.dot_dimension_numbers<[1], [0], [0], [1], [0, 0, 1, 1], [], []>} : vector<4x8xbf16>, vector<8x128xbf16>, vector<4x128xf32> -> vector<4x128xf32>
    %c0_80 = arith.constant 0 : index
    %c0_81 = arith.constant 0 : index
    %191 = vector.load %arg14[%c0_80, %c0_81] : memref<4x8xbf16, #tpu.memory_space<vmem>>, vector<4x8xbf16>
    %192 = arith.truncf %187 : vector<8x128xf32> to vector<8x128xbf16>
    %cst_82 = arith.constant dense<0.000000e+00> : vector<4x128xf32>
    %193 = tpu.matmul %191, %192, %cst_82 {dimension_numbers = #tpu.dot_dimension_numbers<[1], [0], [0], [1], [0, 0, 1, 1], [], []>} : vector<4x8xbf16>, vector<8x128xbf16>, vector<4x128xf32> -> vector<4x128xf32>
    %194 = arith.addf %190, %193 : vector<4x128xf32>
    %c0_83 = arith.constant 0 : index
    %c0_84 = arith.constant 0 : index
    %195 = vector.load %arg15[%c0_83, %c0_84] : memref<4x1xf32, #tpu.memory_space<vmem>>, vector<4x1xf32>
    %196 = vector.broadcast %195 : vector<4x1xf32> to vector<4x128xf32>
    %197 = arith.addf %194, %196 : vector<4x128xf32>
    %cst_85 = arith.constant 0.000000e+00 : f32
    %198 = vector.broadcast %cst_85 : f32 to vector<4x128xf32>
    %199 = arith.subf %198, %197 : vector<4x128xf32>
    %200 = math.exp %199 : vector<4x128xf32>
    %cst_86 = arith.constant 1.000000e+00 : f32
    %201 = vector.broadcast %cst_86 : f32 to vector<4x128xf32>
    %202 = arith.addf %201, %200 : vector<4x128xf32>
    %203 = tpu.reciprocal %202 {approx = true} : vector<4x128xf32> -> vector<4x128xf32>
    %204 = arith.mulf %197, %203 : vector<4x128xf32>
    %c0_87 = arith.constant 0 : index
    %c0_88 = arith.constant 0 : index
    %c0_89 = arith.constant 0 : index
    %205 = vector.load %arg16[%c0_87, %c0_88, %c0_89] : memref<1x4x128xf32, #tpu.memory_space<vmem>>, vector<1x4x128xf32>
    %206 = vector.shape_cast %205 : vector<1x4x128xf32> to vector<4x128xf32>
    %207 = vector.shape_cast %204 : vector<4x128xf32> to vector<1x4x128xf32>
    tpu.vector_store %arg16[%c0_87, %c0_88, %c0_89], %207 {strides = array<i32>} : memref<1x4x128xf32, #tpu.memory_space<vmem>>, vector<1x4x128xf32>,
    return
  }
  func.func @transform_0(%arg0: i32, %arg1: i32) -> (i32, i32, i32) {
    %c0_i32 = arith.constant 0 : i32
    %c0_i32_0 = arith.constant 0 : i32
    return %arg0, %c0_i32, %arg1 : i32, i32, i32
  }
  func.func @transform_1(%arg0: i32, %arg1: i32) -> (i32, i32, i32) {
    %c1_i32 = arith.constant 1 : i32
    %0 = arith.muli %arg1, %c1_i32 : i32
    %c1_i32_0 = arith.constant 1 : i32
    %1 = arith.subi %0, %c1_i32_0 : i32
    %c0_i32 = arith.constant 0 : i32
    %2 = arith.maxsi %1, %c0_i32 : i32
    %c0_i32_1 = arith.constant 0 : i32
    %c0_i32_2 = arith.constant 0 : i32
    return %arg0, %c0_i32_1, %2 : i32, i32, i32
  }
  func.func @transform_2(%arg0: i32, %arg1: i32) -> (i32, i32, i32) {
    %c1_i32 = arith.constant 1 : i32
    %0 = arith.addi %arg1, %c1_i32 : i32
    %c1_i32_0 = arith.constant 1 : i32
    %1 = arith.muli %0, %c1_i32_0 : i32
    %c1_i32_1 = arith.constant 1 : i32
    %2 = arith.minsi %1, %c1_i32_1 : i32
    %c0_i32 = arith.constant 0 : i32
    %c0_i32_2 = arith.constant 0 : i32
    return %arg0, %c0_i32, %2 : i32, i32, i32
  }
  func.func @transform_3(%arg0: i32, %arg1: i32) -> (i32, i32) {
    %c0_i32 = arith.constant 0 : i32
    %c0_i32_0 = arith.constant 0 : i32
    %c0_i32_1 = arith.constant 0 : i32
    return %c0_i32, %c0_i32_0 : i32, i32
  }
  func.func @transform_4(%arg0: i32, %arg1: i32) -> (i32, i32) {
    %c0_i32 = arith.constant 0 : i32
    %c0_i32_0 = arith.constant 0 : i32
    %c0_i32_1 = arith.constant 0 : i32
    return %c0_i32, %c0_i32_0 : i32, i32
  }
  func.func @transform_5(%arg0: i32, %arg1: i32) -> (i32, i32) {
    %c0_i32 = arith.constant 0 : i32
    %c0_i32_0 = arith.constant 0 : i32
    %c0_i32_1 = arith.constant 0 : i32
    return %c0_i32, %c0_i32_0 : i32, i32
  }
  func.func @transform_6(%arg0: i32, %arg1: i32) -> (i32, i32) {
    %c0_i32 = arith.constant 0 : i32
    %c0_i32_0 = arith.constant 0 : i32
    %c0_i32_1 = arith.constant 0 : i32
    return %c0_i32, %c0_i32_0 : i32, i32
  }
  func.func @transform_7(%arg0: i32, %arg1: i32) -> (i32, i32) {
    %c0_i32 = arith.constant 0 : i32
    %c0_i32_0 = arith.constant 0 : i32
    %c0_i32_1 = arith.constant 0 : i32
    return %c0_i32, %c0_i32_0 : i32, i32
  }
  func.func @transform_8(%arg0: i32, %arg1: i32) -> (i32, i32) {
    %c0_i32 = arith.constant 0 : i32
    %c0_i32_0 = arith.constant 0 : i32
    %c0_i32_1 = arith.constant 0 : i32
    return %c0_i32, %c0_i32_0 : i32, i32
  }
  func.func @transform_9(%arg0: i32, %arg1: i32) -> (i32, i32, i32) {
    %c0_i32 = arith.constant 0 : i32
    %c0_i32_0 = arith.constant 0 : i32
    %c0_i32_1 = arith.constant 0 : i32
    %c0_i32_2 = arith.constant 0 : i32
    return %c0_i32, %c0_i32_0, %c0_i32_1 : i32, i32, i32
  }
  func.func @transform_10(%arg0: i32, %arg1: i32) -> (i32, i32) {
    %c0_i32 = arith.constant 0 : i32
    %c0_i32_0 = arith.constant 0 : i32
    %c0_i32_1 = arith.constant 0 : i32
    return %c0_i32, %c0_i32_0 : i32, i32
  }
  func.func @transform_11(%arg0: i32, %arg1: i32) -> (i32, i32) {
    %c0_i32 = arith.constant 0 : i32
    %c0_i32_0 = arith.constant 0 : i32
    %c0_i32_1 = arith.constant 0 : i32
    return %c0_i32, %c0_i32_0 : i32, i32
  }
  func.func @transform_12(%arg0: i32, %arg1: i32) -> (i32, i32) {
    %c0_i32 = arith.constant 0 : i32
    %c0_i32_0 = arith.constant 0 : i32
    %c0_i32_1 = arith.constant 0 : i32
    return %c0_i32, %c0_i32_0 : i32, i32
  }
  func.func @transform_13(%arg0: i32, %arg1: i32) -> (i32, i32) {
    %c0_i32 = arith.constant 0 : i32
    %c0_i32_0 = arith.constant 0 : i32
    %c0_i32_1 = arith.constant 0 : i32
    return %c0_i32, %c0_i32_0 : i32, i32
  }
  func.func @transform_14(%arg0: i32, %arg1: i32) -> (i32, i32, i32) {
    %c0_i32 = arith.constant 0 : i32
    %c0_i32_0 = arith.constant 0 : i32
    return %arg0, %c0_i32, %arg1 : i32, i32, i32
  }
}

</mosaic_0001>

<bundles_post_ra>
// kernel: c3_forward.1
= control target key start
LH: loop header
LB: loop body
LE: loop exit
PB: predicated region body
PF: predicated region fallthrough
CT: control target
= control target key end

     0   :  { %s2143_s29 = smov 0   ;;  %s2145_s30 = smov 0   ;;  %s2393_s0 = inlined_call_operand.vmem [shape: f32[2,4,256], index: 0, kind: input, shape index: {}, may-alias: {0,1,2}]   ;;  %s2394_s1 = inlined_call_operand.vmem [shape: f32[2,4,256], index: 1, kind: input, shape index: {}, may-alias: {0,1,2}]   ;;  %s2395_s2 = inlined_call_operand.vmem [shape: f32[2,4,256], index: 2, kind: input, shape index: {}, may-alias: {0,1,2}]   ;;  %s2396_s3 = inlined_call_operand.vmem [shape: bf16[8,4], index: 3, kind: input, shape index: {}]   ;;  %s2397_s4 = inlined_call_operand.vmem [shape: f32[8,1], index: 4, kind: input, shape index: {}]   ;;  %s2398_s5 = inlined_call_operand.vmem [shape: bf16[8,4], index: 5, kind: input, shape index: {}]   ;;  %s2399_s6 = inlined_call_operand.vmem [shape: f32[8,1], index: 6, kind: input, shape index: {}]   ;;  %s2400_s7 = inlined_call_operand.vmem [shape: bf16[8,8], index: 7, kind: input, shape index: {}]   ;;  %s2401_s8 = inlined_call_operand.vmem [shape: f32[8,1], index: 8, kind: input, shape index: {}]   ;;  %s2402_s9 = inlined_call_operand.vmem [shape: bf16[9,8,8], index: 9, kind: input, shape index: {}]   ;;  %s2403_s10 = inlined_call_operand.vmem [shape: f32[8,1], index: 10, kind: input, shape index: {}]   ;;  %s2404_s11 = inlined_call_operand.vmem [shape: bf16[4,8], index: 11, kind: input, shape index: {}]   ;;  %s2405_s12 = inlined_call_operand.vmem [shape: bf16[4,8], index: 12, kind: input, shape index: {}]   ;;  %s2406_s13 = inlined_call_operand.vmem [shape: f32[4,1], index: 13, kind: input, shape index: {}]   ;;  %s2407_s14 = inlined_call_operand.vmem [shape: f32[2,4,256], index: 14, kind: output, shape index: {}]  }
   0x1   :  { %2408 = sst [smem:[#allocation3_spill]] %s2393_s0  ;;  %s2147_s15 = smov 0  }
   0x2   :  { %2409 = sst [smem:[#allocation4_spill]] %s2397_s4  ;;  %s2149_s16 = smov 0  }
   0x3   :  { %2410 = sst [smem:[#allocation5_spill]] %s2401_s8  ;;  %s2151_s17 = smov 0  }
   0x4 LB: > { %s33_s18 = sadd.s32 1, %s2047_s15  ;;  %s36_s19 = sadd.s32 1, %s2051_s16  ;;  %s2055_s17 = sphi %s2151_s17, %s24_s17   ;;  %s2051_s16 = sphi %s2149_s16, %s2423_s16   ;;  %s2047_s15 = sphi %s2147_s15, %s2422_s15   ;;  %s2043_s30 = sphi %s2145_s30, %s2421_s30   ;;  %s2039_s29 = sphi %s2143_s29, %s2420_s29  }
   0x5   : > { %p34_p0 = scmp.ge.s32.totalorder %s33_s18, 2  ;;  %p1728_p1 = scmp.ge.s32.totalorder %s2055_s17, 1 }
   0x6   : > { %p485_p2 = scmp.lt.s32.totalorder %s2055_s17, 5 }
   0x7   : > { %s2425_s18 = smov (%p34_p0, %s33_s18), 0  ;;  %s2427_s19 = smov (!%p34_p0, %s36_s19), %s2051_s16 }
   0x8   : > { %p486_p3 = pnand %p1728_p1, %p485_p2  ;;  %p38_p4 = scmp.ge.s32.totalorder %s2427_s19, 2 }
   0x9   : > { %p559_p5 = scmp.lt.s32.totalorder (!%p486_p3), %s2043_s30, 1  ;;  %p561_p6 = scmp.lt.s32.totalorder (!%p486_p3), %s2039_s29, 1 }
   0xa   : > { %s2429_s19 = smov (%p38_p4, %s2427_s19), 0  ;;  %489 = sbr.rel (%p486_p3) target bundleno = 1137 (0x471), region = 76 }
   0xb   : > { %2411 = sst [smem:[#allocation2_spill]] %s2429_s19  ;;  %s1731_s20 = sadd.s32 (!%p486_p3), 4294967295, %s2039_s29 }
   0xc   : > { %s581_s21 = sadd.s32 (!%p486_p3), 1, %s2039_s29  ;;  %s2412_s4 = sld [smem:[#allocation4_spill]] (!%p486_p3) }
   0xd   : > { %p568_p7 = scmp.gt.s32.totalorder (!%p486_p3), %s1731_s20, 0  ;;  %s2413_s8 = sld [smem:[#allocation5_spill]] (!%p486_p3) }
   0xe   : > { %p1732_p8 = scmp.lt.s32.totalorder (!%p486_p3), %s1731_s20, 1  ;;  %p582_p9 = scmp.lt.s32.totalorder (!%p486_p3), %s581_s21, 1 }
   0xf   : > { %v2057_v0 = vmov 0.0   ;;  %v2058_v1 = vmov 0   ;;  %s2431_s30 = smov (!%p559_p5, %s2043_s30), 1  ;;  %vm2059_vm0 = vmmov 0   ;;  %s2414_s0 = sld [smem:[#allocation3_spill]]  ;;  %vm621_vm1 = vcmask 1041408  }
  0x10   : > { %1804 = vmatprep.subr.bf16.mxu1 %v2057_v0  ;;  %663 = vmatprep.mubr.bf16.mxu0 %v2058_v1  ;;  %s562_s24 = scalar_select %p561_p6, %s2039_s29, 1  ;;  %v610_v12 = vld [vmem:[%s2396_s3] sm:$0xf]  ;;  %vm617_vm2 = vcmask 31744   ;;  %vm744_vm3 = vcmask 1043456   ;;  %vm740_vm4 = vcmask 64512  }
  0x11   : > { %1806 = vmatprep.mubr.msk.bf16.mxu1 %vm2059_vm0, %v2057_v0  ;;  %1939 = vset.pattern.permute.xlu0 %v2058_v1  ;;  %s1729_s25 = sshll.u32 %s2431_s30, 1  ;;  %s2433_s20 = smov (!%p568_p7, %s1731_s20), 0  ;;  %v733_v48 = vld [vmem:[%s2400_s7] sm:$0xf] }
  0x12   : > { %v611_v2 = vld [vmem:[%s2412_s4] sm:$0xff]  ;;  %1980 = vset.pattern.permute.xlu1 %v2058_v1  ;;  %s564_s28 = sadd.s32 %s1729_s25, %s562_s24  ;;  %s2435_s21 = smov (!%p582_p9, %s581_s21), 1 }
  0x13   : > { %614 = vperm.xlu0 %1939, %v611_v2   ;;  %v734_v3 = vld [vmem:[%s2413_s8] sm:$0xff]  ;;  %s2188_s19 = sshll.u32 %s564_s28, 2  ;;  %s2437_s20 = smov (!%p1732_p8, %s2433_s20), 1 }
  0x14   : > { %s2439_s21 = smov (!%p582_p9, %s2435_s21), 1  ;;  %s575_s30 = sadd.s32 %s2437_s20, %s1729_s25 }
  0x15   : > { %s566_s4 = scalar_lea.vmem %s2414_s0, %s2188_s19  ;;  %s1738_s24 = sshll.u32 %s575_s30, 2 }
  0x16   : > { %v605_v4 = vld [vmem:[%s566_s4] sm:$0xf]  ;;  %s589_s26 = sadd.s32 %s1729_s25, %s2439_s21  ;;  %s577_s22 = scalar_lea.vmem %s2394_s1, %s1738_s24 }
  0x17   : > { %737 = vperm.xlu0 %1939, %v734_v3   ;;  %v2194_v5 = vpack.c.bf16 %v605_v4, %v605_v4  ;;  %s1743_s23 = sshll.u32 %s589_s26, 2  ;;  %v604_v6 = vld [vmem:[%s577_s22] sm:$0xf]  ;;  %p857_p10 = scmp.eq.s32.totalorder %s2039_s29, 0 }
  0x18   : > { %s591_s8 = scalar_lea.vmem %s2395_s2, %s1743_s23  ;;  %v607_v7 = vpack.c.bf16 %v604_v6, %v604_v6  ;;  %p873_p11 = scmp.eq.s32.totalorder %s2039_s29, 1 }
  0x19   : > { %1746 = vmatprep.subr.msk.bf16.mxu0 %vm621_vm1, %v2194_v5  ;;  %v606_v8 = vld [vmem:[%s591_s8] sm:$0xf]  ;;  %s867_s25 = scalar_select %p857_p10, 1, 0 }
  0x1a   : > { %v609_v9 = vpack.c.bf16 %v606_v8, %v606_v8  ;;  %v623_v10 = vsel %vm621_vm1, %v607_v7, 0  ;;  %s883_s30 = scalar_select %p873_p11, 1, 0 }
  0x1b   : > { %646 = vmatpush1.bf16.msra.mxu0 %v623_v10  ;;  %s2060_s29 = smov 15   ;;  %s2061_s24 = smov 16  }
  0x1c   : > { %v629_v11 = vsel %vm621_vm1, %v609_v9, 0  ;;  %s2062_s26 = smov 127   ;;  %s2063_s27 = smov 17  }
  0x1d   : > { %1805 = vmatpush3.bf16.msra.mxu1 %v629_v11  ;;  %v853_v11 = vlaneseq  ;;  %s2064_s28 = smov 112   ;;  %s2065_s22 = smov 1  }
  0x1e   : > { %1810 = vmatprep.subr.bf16.mxu1 %v2057_v0  ;;  %1747 = vmatmul.mubr.msk.bf16.vlgmr.msra.gmra.mxu0 %vm617_vm2, %v610_v12  ;;  %s2066_s20 = smov 113   ;;  %s2067_s8 = smov 111  }
  0x1f   : > { %786 = vmatprep.mubr.bf16.mxu0 %v2058_v1 }
  0x20   : > { %1807 = vmatmul.mubr.msk.bf16.vlgmr.msra.gmra.mxu1 %vm617_vm2, %v610_v12  ;;  %v2234_v12 = vand.u32 127, %v853_v11 }
  0x21   : > { %1812 = vmatprep.mubr.msk.bf16.mxu1 %vm2059_vm0, %v2057_v0 }
  0x22   : > { %vm858_vm5 = vcmp.ge.s32.totalorder %v2234_v12, 112  ;;  %vm1031_vm11 = vcmp.lt.s32.totalorder %v2234_v12, 15  ;;  %vm930_vm12 = vcmp.lt.s32.totalorder %v2234_v12, 16  ;;  %vm919_vm14 = vcmp.lt.s32.totalorder %v2234_v12, 17 }
  0x8e   : > { %v615_v13 = vpop.permute.xlu0 %614 }
  0x92   : > { %v738_v49 = vpop.permute.xlu0 %737 }
  0xde   : > { %v665_v14 = vpop.f32.mrf.mxu0 }
  0xdf   : > { %v666_v15 = vadd.f32 %v665_v14, %v615_v13  ;;  %v856_v14 = vadd.s32 256, %v2234_v12 }
  0xe0   : > { %v706_v16 = vpop.f32.mrf.mxu1  ;;  %v667_v18 = vpop.f32.mrf.mxu0 }
  0xe1   : > { %v707_v17 = vadd.f32 %v706_v16, %v615_v13  ;;  %v712_v19 = vsub.f32 0.0, %v666_v15  ;;  %v668_v20 = vadd.f32 %v667_v18, %v615_v13  ;;  %v868_v13 = vstv %s867_s25  ;;  %s602_s25 = scalar_lea.vmem %s2407_s14, %s2188_s19 }
  0xe2   : > { %v1808_v21 = vpop.f32.mrf.mxu1  ;;  %v669_v23 = vpop.f32.mrf.mxu0  ;;  %vm869_vm6 = vcmp.eq.s32.totalorder %v868_v13, 1  ;;  %vm879_vm8 = vcmp.lt.s32.totalorder %v856_v14, 272 }
  0xe3   : > { %v714_v22 = vsub.f32 0.0, %v707_v17  ;;  %v715_v24 = vmul.f32 1.442695, %v712_v19  ;;  %v713_v25 = vsub.f32 0.0, %v668_v20  ;;  %vm870_vm7 = vmand %vm869_vm6, %vm858_vm5  ;;  %vm1090_vm5 = vcmp.lt.s32.totalorder %v2234_v12, 1 }
  0xe4   : > { %v709_v26 = vpop.f32.mrf.mxu1  ;;  %v670_v28 = vpop.f32.mrf.mxu0  ;;  %vm1197_vm6 = vcmp.lt.s32.totalorder %v2234_v12, 127 }
  0xe5   : > { %v719_v27 = vmul.f32 1.442695, %v714_v22  ;;  %1981 = vpow2.f32 %v715_v24  ;;  %v717_v29 = vmul.f32 1.442695, %v713_v25  ;;  %v1420_v26 = vld [vmem:[%s2403_s10] sm:$0xff] }
  0xe6   : > { %v1809_v30 = vpop.f32.mrf.mxu1  ;;  %v1435_v28 = vld [vmem:[%s2399_s6] sm:$0xff] }
  0xe7   : > { %1983 = vpow2.f32 %v719_v27  ;;  %v1586_v27 = vld [vmem:[%s2406_s13] sm:$0xf] }
  0xe8   : > { %1985 = vpow2.f32 %v717_v29  ;;  %v905_v29 = vand.u32 15, %v2234_v12 }
  0xea   : > { %vm2254_vm13 = vcmp.eq.s32.totalorder %v905_v29, 15  ;;  %vm2261_vm15 = vcmp.eq.s32.totalorder %v905_v29, 0  ;;  %v1761_v29 = vld [vmem:[%s2402_s9 + $0x14] sm:$0xf] }
  0xf2   : > { %v1982_v31 = vpop.eup %1981 }
  0xf3   : > { %v721_v33 = vadd.f32 1.0, %v1982_v31 }
  0xf4   : > { %v1984_v32 = vpop.eup %1983 }
  0xf5   : > { %v1986_v34 = vpop.eup %1985  ;;  %v723_v35 = vadd.f32 1.0, %v1984_v32  ;;  %1987 = vrcp.f32 %v721_v33 }
  0xf6   : > { %v722_v36 = vadd.f32 1.0, %v1986_v34 }
  0xf7   : > { %1989 = vrcp.f32 %v723_v35 }
  0xf8   : > { %1991 = vrcp.f32 %v722_v36 }
 0x102   : > { %v1988_v37 = vpop.eup %1987 }
 0x103   : > { %v727_v39 = vmul.f32 %v1988_v37, %v666_v15  ;;  %v884_v15 = vstv %s883_s30 }
 0x104   : > { %v1990_v38 = vpop.eup %1989  ;;  %vm885_vm9 = vcmp.eq.s32.totalorder %v884_v15, 1 }
 0x105   : > { %v1992_v40 = vpop.eup %1991  ;;  %v729_v41 = vmul.f32 %v1990_v38, %v707_v17  ;;  %v730_v42 = vpack.c.bf16 %v727_v39, %v727_v39  ;;  %vm888_vm10 = vmand %vm885_vm9, %vm879_vm8  ;;  %vm1367_vm8 = vcmp.lt.s32.totalorder %v2234_v12, 111  ;;  %vm1311_vm9 = vcmp.lt.s32.totalorder %v2234_v12, 112 }
 0x106   : > { %v2214_v43 = vmul.f32 %v1992_v40, %v668_v20 }
 0x107   : > { %v732_v44 = vpack.c.bf16 %v729_v41, %v729_v41  ;;  %v746_v47 = vsel %vm744_vm3, %v730_v42, 0 }
 0x108   : > { %v731_v45 = vpack.c.bf16 %v2214_v43, %v2214_v43 }
 0x109   : > { %v752_v46 = vsel %vm744_vm3, %v732_v44, 0 }
 0x10a   : > { %1811 = vmatpush3.bf16.msra.mxu1 %v752_v46  ;;  %1749 = vmatprep.subr.msk.bf16.mxu0 %vm744_vm3, %v731_v45 }
 0x10b   : > { %769 = vmatpush1.bf16.msra.mxu0 %v746_v47  ;;  %1822 = vmatprep.subr.bf16.mxu1 %v2057_v0 }
 0x10c   : > { %1816 = vmatprep.subr.bf16.mxu0 %v2057_v0 }
 0x10d   : > { %1813 = vmatmul.mubr.msk.bf16.vlgmr.msra.gmra.mxu1 %vm740_vm4, %v733_v48 }
 0x10e   : > { %1750 = vmatmul.mubr.msk.bf16.vlgmr.msra.gmra.mxu0 %vm740_vm4, %v733_v48  ;;  %1824 = vmatprep.mubr.msk.bf16.mxu1 %vm2059_vm0, %v2057_v0 }
 0x10f   : > { %1818 = vmatprep.mubr.msk.bf16.mxu0 %vm2059_vm0, %v2057_v0 }
 0x1cd   : > { %v829_v50 = vpop.f32.mrf.mxu1 }
 0x1ce   : > { %v830_v51 = vadd.f32 %v829_v50, %v738_v49  ;;  %v788_v52 = vpop.f32.mrf.mxu0  ;;  %v1752_v50 = vld [vmem:[%s2402_s9 + $0x4] sm:$0xf] }
 0x1cf   : > { %v789_v53 = vadd.f32 %v788_v52, %v738_v49  ;;  %v1814_v54 = vpop.f32.mrf.mxu1 }
 0x1d0   : > { %v837_v55 = vsub.f32 0.0, %v830_v51  ;;  %v790_v56 = vpop.f32.mrf.mxu0 }
 0x1d1   : > { %v835_v57 = vsub.f32 0.0, %v789_v53  ;;  %v791_v58 = vadd.f32 %v790_v56, %v738_v49  ;;  %v832_v59 = vpop.f32.mrf.mxu1 }
 0x1d2   : > { %v842_v60 = vmul.f32 1.442695, %v837_v55  ;;  %v792_v61 = vpop.f32.mrf.mxu0 }
 0x1d3   : > { %v838_v62 = vmul.f32 1.442695, %v835_v57  ;;  %v836_v63 = vsub.f32 0.0, %v791_v58  ;;  %v1815_v1 = vpop.f32.mrf.mxu1 }
 0x1d4   : > { %1993 = vpow2.f32 %v842_v60  ;;  %v793_v2 = vpop.f32.mrf.mxu0 }
 0x1d5   : > { %1995 = vpow2.f32 %v838_v62  ;;  %v840_v3 = vmul.f32 1.442695, %v836_v63  ;;  %v924_v2 = vld [vmem:[%s2402_s9] sm:$0xf] }
 0x1d7   : > { %1997 = vpow2.f32 %v840_v3 }
 0x1e1   : > { %v1994_v4 = vpop.eup %1993 }
 0x1e2   : > { %v1996_v6 = vpop.eup %1995  ;;  %v846_v7 = vadd.f32 1.0, %v1994_v4 }
 0x1e3   : > { %v844_v8 = vadd.f32 1.0, %v1996_v6 }
 0x1e4   : > { %v1998_v9 = vpop.eup %1997 }
 0x1e5   : > { %1999 = vrcp.f32 %v844_v8  ;;  %v845_v10 = vadd.f32 1.0, %v1998_v9  ;;  %v1755_v8 = vld [vmem:[%s2402_s9 + $0x8] sm:$0xf] }
 0x1e6   : > { %2001 = vrcp.f32 %v846_v7 }
 0x1e7   : > { %2003 = vrcp.f32 %v845_v10 }
 0x1f2   : > { %v2000_v16 = vpop.eup %1999 }
 0x1f3   : > { %v2002_v17 = vpop.eup %2001  ;;  %v850_v18 = vmul.f32 %v2000_v16, %v789_v53 }
 0x1f4   : > { %v2004_v19 = vpop.eup %2003  ;;  %v852_v22 = vmul.f32 %v2002_v17, %v830_v51 }
 0x1f5   : > { %v898_v20 = vsel %vm870_vm7, 0.0, %v850_v18  ;;  %v2238_v21 = vmul.f32 %v2004_v19, %v791_v58  ;;  %vm1254_vm7 = vcmp.lt.s32.totalorder %v2234_v12, 113 }
 0x1f6   : > { %v900_v24 = vsel %vm888_vm10, 0.0, %v852_v22 }
 0x1f7   : > { %v1950_v23 = vpack.i.bf16 %v2238_v21, %v898_v20  ;;  %v1960_v25 = vpack.i.bf16 %v900_v24, %v2238_v21  ;;  %v1145_v6 = vpack.c.bf16 %v2238_v21, %v2238_v21  ;;  %v1757_v21 = vld [vmem:[%s2402_s9 + $0xc] sm:$0xf] }
 0x1f9   : > { %1951 = vrot.lane.b32.xlu0 %v1950_v23, %s2060_s29  ;;  %1941 = vrot.lane.b32.xlu1 %v1950_v23, %s2061_s24  ;;  %v1150_v14 = vsel %vm744_vm3, %v1145_v6, 0 }
 0x1fd   : > { %1961 = vrot.lane.b32.xlu0 %v1960_v25, %s2062_s26  ;;  %1946 = vrot.lane.b32.xlu1 %v1950_v23, %s2063_s27 }
 0x201   : > { %1971 = vrot.lane.b32.xlu0 %v1960_v25, %s2064_s28  ;;  %1956 = vrot.lane.b32.xlu1 %v1950_v23, %s2065_s22  ;;  %v1759_v23 = vld [vmem:[%s2402_s9 + $0x10] sm:$0xf] }
 0x205   : > { %1423 = vperm.xlu0 %1939, %v1420_v26   ;;  %1966 = vrot.lane.b32.xlu1 %v1960_v25, %s2066_s20 }
 0x209   : > { %1589 = vperm.xlu0 %1939, %v1586_v27   ;;  %1976 = vrot.lane.b32.xlu1 %v1960_v25, %s2067_s8 }
 0x20d   : > { %1438 = vperm.xlu1 %1980, %v1435_v28  }
 0x26b   : > { %v1952_v30 = vpop.permute.xlu0 %1951  ;;  %v1942_v31 = vpop.permute.xlu1 %1941 }
 0x26c   : > { %v1954_v33 = vunpack.i.h.bf16 %v1952_v30  ;;  %v1953_v34 = vunpack.i.l.bf16 %v1952_v30  ;;  %v1944_v35 = vunpack.i.h.bf16 %v1942_v31  ;;  %v1943_v36 = vunpack.i.l.bf16 %v1942_v31  ;;  %v1763_v31 = vld [vmem:[%s2402_s9 + $0x18] sm:$0xf] }
 0x26e   : > { %v1032_v37 = vsel %vm1031_vm11, %v1953_v34, %v1954_v33  ;;  %v931_v38 = vsel %vm930_vm12, %v1943_v36, %v1944_v35  ;;  %v1765_v34 = vld [vmem:[%s2402_s9 + $0x1c] sm:$0xf]  ;;  %v626_v35 = vsel %vm621_vm1, %v2194_v5, 0  ;;  %v1767_v36 = vld [vmem:[%s2402_s9 + $0x20] sm:$0xf] }
 0x26f   : > { %v1947_v39 = vpop.permute.xlu1 %1946  ;;  %v934_v40 = vpack.c.bf16 %v931_v38, %v931_v38  ;;  %v1035_v41 = vsel %vm2254_vm13, 0.0, %v1032_v37  ;;  %v1962_v48 = vpop.permute.xlu0 %1961  ;;  %v1434_v5 = vld [vmem:[%s2398_s5] sm:$0xf] }
 0x270   : > { %v1949_v42 = vunpack.i.h.bf16 %v1947_v39  ;;  %v1948_v44 = vunpack.i.l.bf16 %v1947_v39  ;;  %v1038_v47 = vpack.c.bf16 %v1035_v41, %v1035_v41  ;;  %v1964_v55 = vunpack.i.h.bf16 %v1962_v48 }
 0x271   : > { %v939_v46 = vsel %vm744_vm3, %v934_v40, 0  ;;  %v1963_v56 = vunpack.i.l.bf16 %v1962_v48 }
 0x272   : > { %v920_v49 = vsel %vm919_vm14, %v1948_v44, %v1949_v42  ;;  %1817 = vmatpush3.bf16.msra.mxu0 %v939_v46  ;;  %v1043_v57 = vsel %vm744_vm3, %v1038_v47, 0 }
 0x273   : > { %v1957_v51 = vpop.permute.xlu1 %1956  ;;  %1828 = vmatprep.subr.bf16.mxu0 %v2057_v0  ;;  %v923_v52 = vsel %vm2261_vm15, 0.0, %v920_v49  ;;  %v1198_v4 = vsel %vm1197_vm6, %v1963_v56, %v1964_v55  ;;  %v1972_v13 = vpop.permute.xlu0 %1971 }
 0x274   : > { %v1959_v53 = vunpack.i.h.bf16 %v1957_v51  ;;  %v1958_v54 = vunpack.i.l.bf16 %v1957_v51  ;;  %v925_v58 = vpack.c.bf16 %v923_v52, %v923_v52  ;;  %v1199_v11 = vsel %vm2254_vm13, 0.0, %v1198_v4 }
 0x275   : > { %1819 = vmatmul.mubr.msk.bf16.vlgmr.msra.gmra.mxu0 %vm740_vm4, %v1752_v50  ;;  %v1202_v18 = vpack.c.bf16 %v1199_v11, %v1199_v11  ;;  %v1974_v19 = vunpack.i.h.bf16 %v1972_v13  ;;  %v1973_v20 = vunpack.i.l.bf16 %v1972_v13 }
 0x276   : > { %v1091_v59 = vsel %vm1090_vm5, %v1958_v54, %v1959_v53  ;;  %1829 = vmatpush3.bf16.msra.mxu0 %v1043_v57  ;;  %1830 = vmatprep.mubr.msk.bf16.mxu0 %vm2059_vm0, %v2057_v0  ;;  %v985_v61 = vsel %vm744_vm3, %v925_v58, 0 }
 0x277   : > { %v1967_v60 = vpop.permute.xlu1 %1966  ;;  %v1092_v62 = vsel %vm2261_vm15, 0.0, %v1091_v59  ;;  %1840 = vmatprep.subr.bf16.mxu0 %v2057_v0  ;;  %1823 = vmatpush3.bf16.msra.mxu1 %v985_v61  ;;  %v1207_v25 = vsel %vm744_vm3, %v1202_v18, 0  ;;  %v1312_v26 = vsel %vm1311_vm9, %v1973_v20, %v1974_v19 }
 0x278   : > { %v1969_v63 = vunpack.i.h.bf16 %v1967_v60  ;;  %v1968_v1 = vunpack.i.l.bf16 %v1967_v60  ;;  %v1095_v3 = vpack.c.bf16 %v1092_v62, %v1092_v62  ;;  %1834 = vmatprep.subr.bf16.mxu1 %v2057_v0  ;;  %v1315_v28 = vpack.c.bf16 %v1312_v26, %v1312_v26 }
 0x27a   : > { %v1100_v7 = vsel %vm744_vm3, %v1095_v3, 0  ;;  %v1255_v9 = vsel %vm1254_vm7, %v1968_v1, %v1969_v63  ;;  %1825 = vmatmul.mubr.msk.bf16.vlgmr.msra.gmra.mxu1 %vm740_vm4, %v924_v2  ;;  %v1320_v33 = vsel %vm744_vm3, %v1315_v28, 0 }
 0x27b   : > { %v1977_v10 = vpop.permute.xlu1 %1976  ;;  %1835 = vmatpush3.bf16.msra.mxu1 %v1100_v7  ;;  %1836 = vmatprep.mubr.msk.bf16.mxu1 %vm2059_vm0, %v2057_v0  ;;  %v1256_v15 = vsel %vm2261_vm15, 0.0, %v1255_v9 }
 0x27c   : > { %1846 = vmatprep.subr.bf16.mxu1 %v2057_v0  ;;  %v1979_v16 = vunpack.i.h.bf16 %v1977_v10  ;;  %v1978_v17 = vunpack.i.l.bf16 %v1977_v10  ;;  %v1259_v22 = vpack.c.bf16 %v1256_v15, %v1256_v15 }
 0x27d   : > { %1831 = vmatmul.mubr.msk.bf16.vlgmr.msra.gmra.mxu0 %vm740_vm4, %v1755_v8 }
 0x27e   : > { %1841 = vmatpush3.bf16.msra.mxu0 %v1150_v14  ;;  %1842 = vmatprep.mubr.msk.bf16.mxu0 %vm2059_vm0, %v2057_v0  ;;  %v1368_v24 = vsel %vm1367_vm8, %v1978_v17, %v1979_v16  ;;  %v1264_v27 = vsel %vm744_vm3, %v1259_v22, 0 }
 0x27f   : > { %1852 = vmatprep.subr.bf16.mxu0 %v2057_v0  ;;  %v1369_v12 = vsel %vm2254_vm13, 0.0, %v1368_v24 }
 0x280   : > { %v1372_v30 = vpack.c.bf16 %v1369_v12, %v1369_v12  ;;  %v1424_v14 = vpop.permute.xlu0 %1423 }
 0x282   : > { %1837 = vmatmul.mubr.msk.bf16.vlgmr.msra.gmra.mxu1 %vm740_vm4, %v1757_v21  ;;  %v1377_v32 = vsel %vm744_vm3, %v1372_v30, 0 }
 0x283   : > { %1847 = vmatpush3.bf16.msra.mxu1 %v1207_v25  ;;  %1848 = vmatprep.mubr.msk.bf16.mxu1 %vm2059_vm0, %v2057_v0 }
 0x284   : > { %1858 = vmatprep.subr.bf16.mxu1 %v2057_v0 }
 0x285   : > { %1843 = vmatmul.mubr.msk.bf16.vlgmr.msra.gmra.mxu0 %vm740_vm4, %v1759_v23 }
 0x286   : > { %1853 = vmatpush3.bf16.msra.mxu0 %v1264_v27  ;;  %1854 = vmatprep.mubr.msk.bf16.mxu0 %vm2059_vm0, %v2057_v0 }
 0x287   : > { %1864 = vmatprep.subr.bf16.mxu0 %v2057_v0 }
 0x288   : > { %v1439_v19 = vpop.permute.xlu1 %1438 }
 0x28a   : > { %1849 = vmatmul.mubr.msk.bf16.vlgmr.msra.gmra.mxu1 %vm740_vm4, %v1761_v29 }
 0x28b   : > { %1859 = vmatpush3.bf16.msra.mxu1 %v1320_v33  ;;  %1860 = vmatprep.mubr.msk.bf16.mxu1 %vm2059_vm0, %v2057_v0 }
 0x28c   : > { %1870 = vmatprep.subr.bf16.mxu1 %v2057_v0 }
 0x28d   : > { %1855 = vmatmul.mubr.msk.bf16.vlgmr.msra.gmra.mxu0 %vm740_vm4, %v1763_v31 }
 0x28e   : > { %1865 = vmatpush3.bf16.msra.mxu0 %v1377_v32  ;;  %1866 = vmatprep.mubr.msk.bf16.mxu0 %vm2059_vm0, %v2057_v0 }
 0x28f   : > { %1876 = vmatprep.subr.bf16.mxu0 %v2057_v0 }
 0x292   : > { %1861 = vmatmul.mubr.msk.bf16.vlgmr.msra.gmra.mxu1 %vm740_vm4, %v1765_v34 }
 0x293   : > { %1871 = vmatpush3.bf16.msra.mxu1 %v626_v35  ;;  %1872 = vmatprep.mubr.msk.bf16.mxu1 %vm2059_vm0, %v2057_v0 }
 0x294   : > { %1882 = vmatprep.subr.bf16.mxu1 %v2057_v0 }
 0x295   : > { %1867 = vmatmul.mubr.msk.bf16.vlgmr.msra.gmra.mxu0 %vm740_vm4, %v1767_v36 }
 0x296   : > { %1878 = vmatprep.mubr.msk.bf16.mxu0 %vm2059_vm0, %v2057_v0 }
 0x29a   : > { %1873 = vmatmul.mubr.msk.bf16.vlgmr.msra.gmra.mxu1 %vm617_vm2, %v1434_v5 }
 0x29b   : > { %1884 = vmatprep.mubr.msk.bf16.mxu1 %vm2059_vm0, %v2057_v0 }
 0x335   : > { %v975_v37 = vpop.f32.mrf.mxu0 }
 0x337   : > { %v1820_v38 = vpop.f32.mrf.mxu0 }
 0x339   : > { %v978_v39 = vpop.f32.mrf.mxu0 }
 0x33a   : > { %v1021_v40 = vpop.f32.mrf.mxu1 }
 0x33b   : > { %v1821_v41 = vpop.f32.mrf.mxu0  ;;  %v1022_v49 = vadd.f32 %v1021_v40, %v975_v37 }
 0x33c   : > { %v1826_v42 = vpop.f32.mrf.mxu1 }
 0x33d   : > { %v1079_v44 = vpop.f32.mrf.mxu0  ;;  %v1490_v42 = vld [vmem:[%s2404_s11] sm:$0x3] }
 0x33e   : > { %v1024_v45 = vpop.f32.mrf.mxu1  ;;  %v1085_v54 = vadd.f32 %v1079_v44, %v1022_v49 }
 0x33f   : > { %v1832_v46 = vpop.f32.mrf.mxu0  ;;  %v1492_v45 = vld [vmem:[%s2405_s12] sm:$0x3] }
 0x340   : > { %v1827_v47 = vpop.f32.mrf.mxu1 }
 0x341   : > { %v1082_v48 = vpop.f32.mrf.mxu0 }
 0x342   : > { %v1136_v50 = vpop.f32.mrf.mxu1  ;;  %v1590_v48 = vpop.permute.xlu0 %1589 }
 0x343   : > { %v1833_v51 = vpop.f32.mrf.mxu0  ;;  %v1142_v0 = vadd.f32 %v1136_v50, %v1085_v54 }
 0x344   : > { %v1838_v52 = vpop.f32.mrf.mxu1 }
 0x345   : > { %v1186_v53 = vpop.f32.mrf.mxu0 }
 0x346   : > { %v1139_v55 = vpop.f32.mrf.mxu1  ;;  %v1192_v61 = vadd.f32 %v1186_v53, %v1142_v0 }
 0x347   : > { %v1844_v56 = vpop.f32.mrf.mxu0 }
 0x348   : > { %v1839_v57 = vpop.f32.mrf.mxu1 }
 0x349   : > { %v1189_v58 = vpop.f32.mrf.mxu0 }
 0x34a   : > { %v1243_v59 = vpop.f32.mrf.mxu1 }
 0x34b   : > { %v1845_v60 = vpop.f32.mrf.mxu0  ;;  %v1249_v1 = vadd.f32 %v1243_v59, %v1192_v61 }
 0x34c   : > { %v1850_v62 = vpop.f32.mrf.mxu1 }
 0x34d   : > { %v1300_v63 = vpop.f32.mrf.mxu0 }
 0x34e   : > { %v1246_v2 = vpop.f32.mrf.mxu1  ;;  %v1306_v7 = vadd.f32 %v1300_v63, %v1249_v1 }
 0x34f   : > { %v1856_v3 = vpop.f32.mrf.mxu0 }
 0x350   : > { %v1851_v4 = vpop.f32.mrf.mxu1 }
 0x351   : > { %v1303_v6 = vpop.f32.mrf.mxu0 }
 0x352   : > { %v1356_v8 = vpop.f32.mrf.mxu1 }
 0x353   : > { %v1857_v9 = vpop.f32.mrf.mxu0  ;;  %v1362_v10 = vadd.f32 %v1356_v8, %v1306_v7 }
 0x354   : > { %v1862_v11 = vpop.f32.mrf.mxu1 }
 0x355   : > { %v1413_v13 = vpop.f32.mrf.mxu0 }
 0x356   : > { %v1419_v15 = vadd.f32 %v1413_v13, %v1362_v10  ;;  %v1359_v16 = vpop.f32.mrf.mxu1 }
 0x357   : > { %v1868_v17 = vpop.f32.mrf.mxu0 }
 0x358   : > { %v1426_v18 = vadd.f32 %v1424_v14, %v1419_v15  ;;  %v1863_v20 = vpop.f32.mrf.mxu1 }
 0x359   : > { %v1416_v21 = vpop.f32.mrf.mxu0 }
 0x35a   : > { %v1427_v22 = vsub.f32 0.0, %v1426_v18  ;;  %v1478_v23 = vpop.f32.mrf.mxu1 }
 0x35b   : > { %v1869_v24 = vpop.f32.mrf.mxu0  ;;  %v1479_v26 = vadd.f32 %v1478_v23, %v1439_v19 }
 0x35c   : > { %v1428_v25 = vmul.f32 1.442695, %v1427_v22  ;;  %v1874_v27 = vpop.f32.mrf.mxu1 }
 0x35d   : > { %v1484_v12 = vsub.f32 0.0, %v1479_v26 }
 0x35e   : > { %2005 = vpow2.f32 %v1428_v25  ;;  %v1481_v28 = vpop.f32.mrf.mxu1 }
 0x35f   : > { %v1485_v29 = vmul.f32 1.442695, %v1484_v12 }
 0x360   : > { %v1875_v30 = vpop.f32.mrf.mxu1 }
 0x361   : > { %2007 = vpow2.f32 %v1485_v29 }
 0x36b   : > { %v2006_v31 = vpop.eup %2005 }
 0x36c   : > { %v1430_v33 = vadd.f32 1.0, %v2006_v31 }
 0x36e   : > { %2009 = vrcp.f32 %v1430_v33  ;;  %v2008_v32 = vpop.eup %2007 }
 0x36f   : > { %v1487_v34 = vadd.f32 1.0, %v2008_v32 }
 0x371   : > { %2011 = vrcp.f32 %v1487_v34 }
 0x37b   : > { %v2010_v35 = vpop.eup %2009 }
 0x37c   : > { %v1432_v36 = vmul.f32 %v2010_v35, %v1426_v18 }
 0x37e   : > { %v1433_v5 = vadd.f32 %v1432_v36, %v2214_v43  ;;  %v2012_v37 = vpop.eup %2011 }
 0x37f   : > { %v1489_v38 = vmul.f32 %v2012_v37, %v1479_v26 }
 0x380   : > { %v1491_v39 = vpack.c.bf16 %v1433_v5, %v1433_v5 }
 0x381   : > { %v1493_v40 = vpack.c.bf16 %v1489_v38, %v1489_v38 }
 0x382   : > { %v1544_v41 = vsel %vm744_vm3, %v1491_v39, 0 }
 0x383   : > { %1883 = vmatpush3.bf16.msra.mxu1 %v1544_v41  ;;  %v1498_v44 = vsel %vm744_vm3, %v1493_v40, 0 }
 0x384   : > { %1877 = vmatpush3.bf16.msra.mxu0 %v1498_v44 }
 0x386   : > { %1885 = vmatmul.mubr.msk.bf16.vlgmr.msra.gmra.mxu1 %vm740_vm4, %v1490_v42 }
 0x387   : > { %1879 = vmatmul.mubr.msk.bf16.vlgmr.msra.gmra.mxu0 %vm740_vm4, %v1492_v45 }
 0x446   : > { %v1580_v43 = vpop.f32.mrf.mxu1 }
 0x447   : > { %v1534_v46 = vpop.f32.mrf.mxu0 }
 0x448   : > { %v1886_v47 = vpop.f32.mrf.mxu1  ;;  %v1581_v49 = vadd.f32 %v1580_v43, %v1534_v46 }
 0x449   : > { %v1880_v50 = vpop.f32.mrf.mxu0 }
 0x44a   : > { %v1583_v51 = vpop.f32.mrf.mxu1  ;;  %v1592_v52 = vadd.f32 %v1590_v48, %v1581_v49 }
 0x44b   : > { %v1537_v53 = vpop.f32.mrf.mxu0 }
 0x44c   : > { %v1887_v54 = vpop.f32.mrf.mxu1  ;;  %v1593_v55 = vsub.f32 0.0, %v1592_v52 }
 0x44d   : > { %v1881_v56 = vpop.f32.mrf.mxu0 }
 0x44e   : > { %v1594_v0 = vmul.f32 1.442695, %v1593_v55 }
 0x450   : > { %2013 = vpow2.f32 %v1594_v0 }
 0x45d   : > { %v2014_v57 = vpop.eup %2013 }
 0x45e   : > { %v1596_v58 = vadd.f32 1.0, %v2014_v57 }
 0x460   : > { %2015 = vrcp.f32 %v1596_v58 }
 0x46d   : > { %v2016_v59 = vpop.eup %2015 }
 0x46e   : > { %v1598_v60 = vmul.f32 %v2016_v59, %v1592_v52 }
 0x470   : > { %1599 = vst [vmem:[%s602_s25] sm:$0xf] %v1598_v60 }
 0x471 PF: > { %s24_s17 = sadd.s32 1, %s2055_s17   ;;  %s2419_s24 = sld [smem:[#allocation2_spill]] }
 0x472   : > { %p21_p12 = scmp.ge.s32.totalorder %s24_s17, 6   ;;  %s2420_s29 = smov %s2047_s15 }
 0x473   : > { %s2421_s30 = smov %s2051_s16  ;;  %s2422_s15 = smov %s2425_s18 }
 0x474   :  { %23 = sbr.rel (!%p21_p12) target bundleno = 4 (0x4), region = 120 }
 0x477   : > { %s2423_s16 = smov %s2419_s24 }

</bundles_post_ra>
